<compile_context>
chip_gen: v5e
topology: v5e:2x2
jax: 0.10.0
libtpu: 0.0.40
codegen_flags: <defaults>
</compile_context>

<pallas_src>
import functools
import math

import jax
import jax.numpy as jnp
from jax import lax
from jax.experimental import pallas as pl
from jax.experimental.pallas import tpu as pltpu


def attention_kernel(xi_ref, xj_ref, wq_ref, bq_ref, wk_ref, bk_ref, o_ref,
                     ki_sc, m_sc, l_sc, acc_sc, *, d_k):
    # xi_ref: (1, tq,  F)  rows that define the OUTPUT rows (K-projected)
    # xj_ref: (1, tkv, F)  rows reduced over by the softmax (Q-projected + values)
    # wq_ref: (F, d_k), bq_ref: (1, d_k), wk_ref: (F, d_k), bk_ref: (1, d_k)
    # o_ref:  (1, tq, F)
    # ki_sc:  (tq, d_k) f32   m_sc/l_sc: (tq, 1) f32   acc_sc: (tq, F) f32
    j = pl.program_id(2)

    @pl.when(j == 0)
    def _init():
        # K projection of the output-row block: computed once per (b, i) tile,
        # stashed in scratch for the whole kv sweep.  Single 2-D MXU push.
        xi = xi_ref[...][0]                                   # (tq, F), native dtype
        k_i = jnp.dot(xi, wk_ref[...], preferred_element_type=jnp.float32)
        ki_sc[...] = k_i + bk_ref[...].astype(jnp.float32)    # (tq, d_k) f32
        m_sc[...] = jnp.full_like(m_sc, -jnp.inf)
        l_sc[...] = jnp.zeros_like(l_sc)
        acc_sc[...] = jnp.zeros_like(acc_sc)

    # Q projection of the kv block (the rows the softmax reduces over).
    xj = xj_ref[...][0]                                       # (tkv, F), native dtype
    q_lin = jnp.dot(xj, wq_ref[...], preferred_element_type=jnp.float32)
    q_lin = q_lin + bq_ref[...].astype(jnp.float32)
    # Fold 1/sqrt(d_k) onto q (tkv*d_k elems) instead of the (tq, tkv) scores.
    q_j = jnp.tanh(q_lin) * (1.0 / math.sqrt(d_k))            # (tkv, d_k) f32

    # Transposed scores directly: s[i, j] = k_i[i] . q_j[j]  (contract d_k).
    # TODO(synk): per review, confirm via pl.lower_as_mlir that this contracting-dim
    # dot does not emit a per-step vxpose of q_j; if it does, the transpose is a
    # single tiny (tkv, d_k) relayout per kv step (d_k = in_features/10 is small).
    s = lax.dot_general(ki_sc[...], q_j, (((1,), (1,)), ((), ())),
                        preferred_element_type=jnp.float32)    # (tq, tkv) f32

    # Online softmax update (running max / denominator / un-normalized accumulator).
    m_prev = m_sc[...]
    m_new = jnp.maximum(m_prev, jnp.max(s, axis=-1, keepdims=True))
    alpha = jnp.exp(m_prev - m_new)
    p = jnp.exp(s - m_new)
    l_sc[...] = alpha * l_sc[...] + jnp.sum(p, axis=-1, keepdims=True)
    acc_sc[...] = alpha * acc_sc[...] + jnp.dot(
        p.astype(xj.dtype), xj, preferred_element_type=jnp.float32)
    m_sc[...] = m_new

    @pl.when(j == pl.num_programs(2) - 1)
    def _finalize():
        # Deferred normalization: one (tq, F) scale via the EUP approx reciprocal.
        out = acc_sc[...] * pl.reciprocal(l_sc[...], approx=True)
        # TODO(synk): for production, keep F a multiple of 128 so this store is an
        # unmasked lane-dense vst (F=32 in the test -> masked partial stores).
        o_ref[...] = out[None].astype(o_ref.dtype)


def _pick_tile(n, pref):
    for t in (pref, 256, 128, 64, 32, 16, 8):
        if t <= n and n % t == 0:
            return t
    return n


def attention_pallas(inp, wq, bq, wk, bk, *, q_tile=256, kv_tile=256):
    B, N, F = inp.shape
    d_k = wq.shape[1]
    tq = _pick_tile(N, q_tile)     # 256 = v6e/v7x MXU-native M; falls back for small N
    tkv = _pick_tile(N, kv_tile)

    bq2 = bq.reshape(1, d_k)
    bk2 = bk.reshape(1, d_k)

    grid = (B, N // tq, N // tkv)  # batch & q-tile parallel, kv-tile innermost reduction
    kernel = functools.partial(attention_kernel, d_k=d_k)

    return pl.pallas_call(
        kernel,
        out_shape=jax.ShapeDtypeStruct((B, N, F), inp.dtype),
        grid_spec=pltpu.PrefetchScalarGridSpec(
            num_scalar_prefetch=0,
            grid=grid,
            in_specs=[
                # Same input array passed twice with different tilings:
                pl.BlockSpec((1, tq, F), lambda b, i, j: (b, i, 0)),   # output rows (K-proj)
                pl.BlockSpec((1, tkv, F), lambda b, i, j: (b, j, 0)),  # kv rows (Q-proj + values)
                pl.BlockSpec((F, d_k), lambda b, i, j: (0, 0)),        # Wq
                pl.BlockSpec((1, d_k), lambda b, i, j: (0, 0)),        # bq
                pl.BlockSpec((F, d_k), lambda b, i, j: (0, 0)),        # Wk
                pl.BlockSpec((1, d_k), lambda b, i, j: (0, 0)),        # bk
            ],
            out_specs=pl.BlockSpec((1, tq, F), lambda b, i, j: (b, i, 0)),
            scratch_shapes=[
                pltpu.VMEM((tq, d_k), jnp.float32),   # K of output rows (per (b, i))
                pltpu.VMEM((tq, 1), jnp.float32),     # running max
                pltpu.VMEM((tq, 1), jnp.float32),     # running denominator
                pltpu.VMEM((tq, F), jnp.float32),     # un-normalized output accumulator
            ],
        ),
        compiler_params=pltpu.CompilerParams(
            dimension_semantics=("parallel", "parallel", "arbitrary"),
            # Explicit scoped-VMEM budget; safe on v5e/v6e (128 MiB) and v7x (64 MiB).
            vmem_limit_bytes=48 * 1024 * 1024,
        ),
    )(inp, inp, wq, bq2, wk, bk2)


def attention_reference(inp, wq, bq, wk, bk):
    d_k = wq.shape[1]
    q = jnp.tanh(jnp.einsum("bnf,fd->bnd", inp, wq) + bq)
    k = jnp.einsum("bnf,fd->bnd", inp, wk) + bk
    s = jnp.einsum("bnd,bmd->bnm", q, k) / math.sqrt(d_k)
    s = jnp.swapaxes(s, 1, 2)
    a = jax.nn.softmax(s, axis=2)
    return jnp.einsum("bnm,bmf->bnf", a, inp)


if __name__ == "__main__":
    B, N, F = 2, 8, 32
    d_k = max(F // 10, 1)  # = 3, matches nn module: max(floor(in_features/10), 1)

    key = jax.random.PRNGKey(0)
    k1, k2, k3, k4, k5 = jax.random.split(key, 5)

    inp = jax.random.normal(k1, (B, N, F), dtype=jnp.float32)
    bound = 1.0 / math.sqrt(F)
    wq = jax.random.uniform(k2, (F, d_k), minval=-bound, maxval=bound, dtype=jnp.float32)
    bq = jax.random.uniform(k3, (d_k,), minval=-bound, maxval=bound, dtype=jnp.float32)
    wk = jax.random.uniform(k4, (F, d_k), minval=-bound, maxval=bound, dtype=jnp.float32)
    bk = jax.random.uniform(k5, (d_k,), minval=-bound, maxval=bound, dtype=jnp.float32)

    out = attention_pallas(inp, wq, bq, wk, bk)
    jax.block_until_ready(out)

    ref = attention_reference(inp, wq, bq, wk, bk)
    assert out.shape == (B, N, F)
    # Tolerance accounts for the EUP approximate reciprocal used in the (single,
    # deferred) softmax normalization; use approx=False if this ever backs training.
    assert jnp.allclose(out, ref, atol=5e-3, rtol=5e-3), "mismatch vs reference"

    print("KERNEL_OK")
</pallas_src>

<mosaic_0001>
module attributes {stable_mosaic.version = 11 : i64} {
  func.func @attention_kernel(%arg0: i32, %arg1: i32, %arg2: i32, %arg3: memref<1x8x32xf32, #tpu.memory_space<vmem>>, %arg4: memref<1x8x32xf32, #tpu.memory_space<vmem>>, %arg5: memref<32x3xf32, #tpu.memory_space<vmem>>, %arg6: memref<1x3xf32, #tpu.memory_space<vmem>>, %arg7: memref<32x3xf32, #tpu.memory_space<vmem>>, %arg8: memref<1x3xf32, #tpu.memory_space<vmem>>, %arg9: memref<1x8x32xf32, #tpu.memory_space<vmem>>, %arg10: memref<8x3xf32, #tpu.memory_space<vmem>>, %arg11: memref<8x1xf32, #tpu.memory_space<vmem>>, %arg12: memref<8x1xf32, #tpu.memory_space<vmem>>, %arg13: memref<8x32xf32, #tpu.memory_space<vmem>>) attributes {dimension_semantics = [#tpu.dimension_semantics<parallel>, #tpu.dimension_semantics<parallel>, #tpu.dimension_semantics<arbitrary>], iteration_bounds = array<i64: 2, 1, 1>, scalar_prefetch = 0 : i64, scratch_operands = 4 : i64, tpu.core_type = #tpu.core_type<tc>, window_params = [{transform_indices = @transform_0, window_bounds = array<i64: 1, 8, 32>}, {transform_indices = @transform_1, window_bounds = array<i64: 1, 8, 32>}, {pipeline_mode = #tpu.pipeline_mode<synchronous>, transform_indices = @transform_2, window_bounds = array<i64: 32, 3>}, {pipeline_mode = #tpu.pipeline_mode<synchronous>, transform_indices = @transform_3, window_bounds = array<i64: 1, 3>}, {pipeline_mode = #tpu.pipeline_mode<synchronous>, transform_indices = @transform_4, window_bounds = array<i64: 32, 3>}, {pipeline_mode = #tpu.pipeline_mode<synchronous>, transform_indices = @transform_5, window_bounds = array<i64: 1, 3>}, {transform_indices = @transform_6, window_bounds = array<i64: 1, 8, 32>}]} {
    %c0_i32 = arith.constant 0 : i32
    %0 = arith.cmpi eq, %arg2, %c0_i32 : i32
    %1 = arith.extui %0 : i1 to i32
    %c0_i32_0 = arith.constant 0 : i32
    %2 = arith.cmpi ne, %1, %c0_i32_0 : i32
    scf.if %2 {
      %c0_28 = arith.constant 0 : index
      %c0_29 = arith.constant 0 : index
      %c0_30 = arith.constant 0 : index
      %40 = vector.load %arg3[%c0_28, %c0_29, %c0_30] : memref<1x8x32xf32, #tpu.memory_space<vmem>>, vector<1x8x32xf32>
      %41 = vector.shape_cast %40 : vector<1x8x32xf32> to vector<8x32xf32>
      %c0_31 = arith.constant 0 : index
      %c0_32 = arith.constant 0 : index
      %42 = vector.load %arg7[%c0_31, %c0_32] : memref<32x3xf32, #tpu.memory_space<vmem>>, vector<32x3xf32>
      %cst_33 = arith.constant dense<0.000000e+00> : vector<8x3xf32>
      %43 = tpu.matmul %41, %42, %cst_33 {dimension_numbers = #tpu.dot_dimension_numbers<[1], [0], [0], [1], [0, 0, 1, 1], [], []>} : vector<8x32xf32>, vector<32x3xf32>, vector<8x3xf32> -> vector<8x3xf32>
      %c0_34 = arith.constant 0 : index
      %c0_35 = arith.constant 0 : index
      %44 = vector.load %arg8[%c0_34, %c0_35] : memref<1x3xf32, #tpu.memory_space<vmem>>, vector<1x3xf32>
      %45 = vector.broadcast %44 : vector<1x3xf32> to vector<8x3xf32>
      %46 = arith.addf %43, %45 : vector<8x3xf32>
      %c0_36 = arith.constant 0 : index
      %c0_37 = arith.constant 0 : index
      %47 = vector.load %arg10[%c0_36, %c0_37] : memref<8x3xf32, #tpu.memory_space<vmem>>, vector<8x3xf32>
      tpu.vector_store %arg10[%c0_36, %c0_37], %46 {strides = array<i32>} : memref<8x3xf32, #tpu.memory_space<vmem>>, vector<8x3xf32>,
      %cst_38 = arith.constant 0xFF800000 : f32
      %48 = vector.broadcast %cst_38 : f32 to vector<8x1xf32>
      %c0_39 = arith.constant 0 : index
      %c0_40 = arith.constant 0 : index
      %49 = vector.load %arg11[%c0_39, %c0_40] : memref<8x1xf32, #tpu.memory_space<vmem>>, vector<8x1xf32>
      tpu.vector_store %arg11[%c0_39, %c0_40], %48 {strides = array<i32>} : memref<8x1xf32, #tpu.memory_space<vmem>>, vector<8x1xf32>,
      %cst_41 = arith.constant 0.000000e+00 : f32
      %50 = vector.broadcast %cst_41 : f32 to vector<8x1xf32>
      %c0_42 = arith.constant 0 : index
      %c0_43 = arith.constant 0 : index
      %51 = vector.load %arg12[%c0_42, %c0_43] : memref<8x1xf32, #tpu.memory_space<vmem>>, vector<8x1xf32>
      tpu.vector_store %arg12[%c0_42, %c0_43], %50 {strides = array<i32>} : memref<8x1xf32, #tpu.memory_space<vmem>>, vector<8x1xf32>,
      %cst_44 = arith.constant 0.000000e+00 : f32
      %52 = vector.broadcast %cst_44 : f32 to vector<8x32xf32>
      %c0_45 = arith.constant 0 : index
      %c0_46 = arith.constant 0 : index
      %53 = vector.load %arg13[%c0_45, %c0_46] : memref<8x32xf32, #tpu.memory_space<vmem>>, vector<8x32xf32>
      tpu.vector_store %arg13[%c0_45, %c0_46], %52 {strides = array<i32>} : memref<8x32xf32, #tpu.memory_space<vmem>>, vector<8x32xf32>,
    } else {
    }
    %c0 = arith.constant 0 : index
    %c0_1 = arith.constant 0 : index
    %c0_2 = arith.constant 0 : index
    %3 = vector.load %arg4[%c0, %c0_1, %c0_2] : memref<1x8x32xf32, #tpu.memory_space<vmem>>, vector<1x8x32xf32>
    %4 = vector.shape_cast %3 : vector<1x8x32xf32> to vector<8x32xf32>
    %c0_3 = arith.constant 0 : index
    %c0_4 = arith.constant 0 : index
    %5 = vector.load %arg5[%c0_3, %c0_4] : memref<32x3xf32, #tpu.memory_space<vmem>>, vector<32x3xf32>
    %cst = arith.constant dense<0.000000e+00> : vector<8x3xf32>
    %6 = tpu.matmul %4, %5, %cst {dimension_numbers = #tpu.dot_dimension_numbers<[1], [0], [0], [1], [0, 0, 1, 1], [], []>} : vector<8x32xf32>, vector<32x3xf32>, vector<8x3xf32> -> vector<8x3xf32>
    %c0_5 = arith.constant 0 : index
    %c0_6 = arith.constant 0 : index
    %7 = vector.load %arg6[%c0_5, %c0_6] : memref<1x3xf32, #tpu.memory_space<vmem>>, vector<1x3xf32>
    %8 = vector.broadcast %7 : vector<1x3xf32> to vector<8x3xf32>
    %9 = arith.addf %6, %8 : vector<8x3xf32>
    %10 = math.tanh %9 : vector<8x3xf32>
    %cst_7 = arith.constant 0.577350259 : f32
    %11 = vector.broadcast %cst_7 : f32 to vector<8x3xf32>
    %12 = arith.mulf %10, %11 : vector<8x3xf32>
    %c0_8 = arith.constant 0 : index
    %c0_9 = arith.constant 0 : index
    %13 = vector.load %arg10[%c0_8, %c0_9] : memref<8x3xf32, #tpu.memory_space<vmem>>, vector<8x3xf32>
    %cst_10 = arith.constant dense<0.000000e+00> : vector<8x8xf32>
    %14 = tpu.matmul %13, %12, %cst_10 {dimension_numbers = #tpu.dot_dimension_numbers<[1], [1], [0], [0], [0, 0, 1, 0], [], []>} : vector<8x3xf32>, vector<8x3xf32>, vector<8x8xf32> -> vector<8x8xf32>
    %c0_11 = arith.constant 0 : index
    %c0_12 = arith.constant 0 : index
    %15 = vector.load %arg11[%c0_11, %c0_12] : memref<8x1xf32, #tpu.memory_space<vmem>>, vector<8x1xf32>
    %cst_13 = arith.constant dense<0xFF800000> : vector<8xf32>
    %16 = vector.multi_reduction <maximumf>, %14, %cst_13 [1] : vector<8x8xf32> to vector<8xf32>
    %17 = vector.shape_cast %16 : vector<8xf32> to vector<8x1xf32>
    %18 = arith.maximumf %15, %17 : vector<8x1xf32>
    %19 = arith.subf %15, %18 : vector<8x1xf32>
    %20 = math.exp %19 : vector<8x1xf32>
    %21 = vector.broadcast %18 : vector<8x1xf32> to vector<8x8xf32>
    %22 = arith.subf %14, %21 : vector<8x8xf32>
    %23 = math.exp %22 : vector<8x8xf32>
    %c0_14 = arith.constant 0 : index
    %c0_15 = arith.constant 0 : index
    %24 = vector.load %arg12[%c0_14, %c0_15] : memref<8x1xf32, #tpu.memory_space<vmem>>, vector<8x1xf32>
    %25 = arith.mulf %20, %24 : vector<8x1xf32>
    %cst_16 = arith.constant dense<0.000000e+00> : vector<8xf32>
    %26 = vector.multi_reduction <add>, %23, %cst_16 [1] : vector<8x8xf32> to vector<8xf32>
    %27 = vector.shape_cast %26 : vector<8xf32> to vector<8x1xf32>
    %28 = arith.addf %25, %27 : vector<8x1xf32>
    %c0_17 = arith.constant 0 : index
    %c0_18 = arith.constant 0 : index
    %29 = vector.load %arg12[%c0_17, %c0_18] : memref<8x1xf32, #tpu.memory_space<vmem>>, vector<8x1xf32>
    tpu.vector_store %arg12[%c0_17, %c0_18], %28 {strides = array<i32>} : memref<8x1xf32, #tpu.memory_space<vmem>>, vector<8x1xf32>,
    %c0_19 = arith.constant 0 : index
    %c0_20 = arith.constant 0 : index
    %30 = vector.load %arg13[%c0_19, %c0_20] : memref<8x32xf32, #tpu.memory_space<vmem>>, vector<8x32xf32>
    %31 = vector.broadcast %20 : vector<8x1xf32> to vector<8x32xf32>
    %32 = arith.mulf %31, %30 : vector<8x32xf32>
    %cst_21 = arith.constant dense<0.000000e+00> : vector<8x32xf32>
    %33 = tpu.matmul %23, %4, %cst_21 {dimension_numbers = #tpu.dot_dimension_numbers<[1], [0], [0], [1], [0, 0, 1, 1], [], []>} : vector<8x8xf32>, vector<8x32xf32>, vector<8x32xf32> -> vector<8x32xf32>
    %34 = arith.addf %32, %33 : vector<8x32xf32>
    %c0_22 = arith.constant 0 : index
    %c0_23 = arith.constant 0 : index
    %35 = vector.load %arg13[%c0_22, %c0_23] : memref<8x32xf32, #tpu.memory_space<vmem>>, vector<8x32xf32>
    tpu.vector_store %arg13[%c0_22, %c0_23], %34 {strides = array<i32>} : memref<8x32xf32, #tpu.memory_space<vmem>>, vector<8x32xf32>,
    %c0_24 = arith.constant 0 : index
    %c0_25 = arith.constant 0 : index
    %36 = vector.load %arg11[%c0_24, %c0_25] : memref<8x1xf32, #tpu.memory_space<vmem>>, vector<8x1xf32>
    tpu.vector_store %arg11[%c0_24, %c0_25], %18 {strides = array<i32>} : memref<8x1xf32, #tpu.memory_space<vmem>>, vector<8x1xf32>,
    %c0_i32_26 = arith.constant 0 : i32
    %37 = arith.cmpi eq, %arg2, %c0_i32_26 : i32
    %38 = arith.extui %37 : i1 to i32
    %c0_i32_27 = arith.constant 0 : i32
    %39 = arith.cmpi ne, %38, %c0_i32_27 : i32
    scf.if %39 {
      %c0_28 = arith.constant 0 : index
      %c0_29 = arith.constant 0 : index
      %40 = vector.load %arg13[%c0_28, %c0_29] : memref<8x32xf32, #tpu.memory_space<vmem>>, vector<8x32xf32>
      %c0_30 = arith.constant 0 : index
      %c0_31 = arith.constant 0 : index
      %41 = vector.load %arg12[%c0_30, %c0_31] : memref<8x1xf32, #tpu.memory_space<vmem>>, vector<8x1xf32>
      %42 = tpu.reciprocal %41 {approx = true} : vector<8x1xf32> -> vector<8x1xf32>
      %43 = vector.broadcast %42 : vector<8x1xf32> to vector<8x32xf32>
      %44 = arith.mulf %40, %43 : vector<8x32xf32>
      %45 = vector.shape_cast %44 : vector<8x32xf32> to vector<1x8x32xf32>
      %c0_32 = arith.constant 0 : index
      %c0_33 = arith.constant 0 : index
      %c0_34 = arith.constant 0 : index
      %46 = vector.load %arg9[%c0_32, %c0_33, %c0_34] : memref<1x8x32xf32, #tpu.memory_space<vmem>>, vector<1x8x32xf32>
      tpu.vector_store %arg9[%c0_32, %c0_33, %c0_34], %45 {strides = array<i32>} : memref<1x8x32xf32, #tpu.memory_space<vmem>>, vector<1x8x32xf32>,
    } else {
    }
    return
  }
  func.func @transform_0(%arg0: i32, %arg1: i32, %arg2: i32) -> (i32, i32, i32) {
    %c0_i32 = arith.constant 0 : i32
    %c0_i32_0 = arith.constant 0 : i32
    return %arg0, %arg1, %c0_i32 : i32, i32, i32
  }
  func.func @transform_1(%arg0: i32, %arg1: i32, %arg2: i32) -> (i32, i32, i32) {
    %c0_i32 = arith.constant 0 : i32
    %c0_i32_0 = arith.constant 0 : i32
    return %arg0, %arg2, %c0_i32 : i32, i32, i32
  }
  func.func @transform_2(%arg0: i32, %arg1: i32, %arg2: i32) -> (i32, i32) {
    %c0_i32 = arith.constant 0 : i32
    %c0_i32_0 = arith.constant 0 : i32
    %c0_i32_1 = arith.constant 0 : i32
    return %c0_i32, %c0_i32_0 : i32, i32
  }
  func.func @transform_3(%arg0: i32, %arg1: i32, %arg2: i32) -> (i32, i32) {
    %c0_i32 = arith.constant 0 : i32
    %c0_i32_0 = arith.constant 0 : i32
    %c0_i32_1 = arith.constant 0 : i32
    return %c0_i32, %c0_i32_0 : i32, i32
  }
  func.func @transform_4(%arg0: i32, %arg1: i32, %arg2: i32) -> (i32, i32) {
    %c0_i32 = arith.constant 0 : i32
    %c0_i32_0 = arith.constant 0 : i32
    %c0_i32_1 = arith.constant 0 : i32
    return %c0_i32, %c0_i32_0 : i32, i32
  }
  func.func @transform_5(%arg0: i32, %arg1: i32, %arg2: i32) -> (i32, i32) {
    %c0_i32 = arith.constant 0 : i32
    %c0_i32_0 = arith.constant 0 : i32
    %c0_i32_1 = arith.constant 0 : i32
    return %c0_i32, %c0_i32_0 : i32, i32
  }
  func.func @transform_6(%arg0: i32, %arg1: i32, %arg2: i32) -> (i32, i32, i32) {
    %c0_i32 = arith.constant 0 : i32
    %c0_i32_0 = arith.constant 0 : i32
    return %arg0, %arg1, %c0_i32 : i32, i32, i32
  }
}

</mosaic_0001>

<bundles_post_ra>
// kernel: tpu_custom_call.1
= control target key start
LH: loop header
LB: loop body
LE: loop exit
PB: predicated region body
PF: predicated region fallthrough
CT: control target
= control target key end

     0   :  { %11 = vsyncpa [#allocation7], 0  ;;  %s938_s0 = inlined_call_operand.vmem [shape: f32[2,8,32], index: 0, kind: input, shape index: {}]   ;;  %s939_s1 = inlined_call_operand.vmem [shape: f32[2,8,32], index: 1, kind: input, shape index: {}]   ;;  %s940_s2 = inlined_call_operand.vmem [shape: f32[32,3], index: 2, kind: input, shape index: {}]   ;;  %s941_s3 = inlined_call_operand.vmem [shape: f32[1,3], index: 3, kind: input, shape index: {}]   ;;  %s942_s4 = inlined_call_operand.vmem [shape: f32[32,3], index: 4, kind: input, shape index: {}]   ;;  %s943_s5 = inlined_call_operand.vmem [shape: f32[1,3], index: 5, kind: input, shape index: {}]   ;;  %s944_s6 = inlined_call_operand.hbm [shape: f32[2,8,32], index: 6, kind: output, shape index: {}]  }
   0x1   :  { %13 = vsyncpa [#allocation7 + $0x1], 0  ;;  %s796_s21 = smov 0   ;;  %s798_s22 = smov 0  }
   0x2   :  { %s800_s23 = smov 0   ;;  %s802_s24 = smov 0  }
   0x3   :  { %s804_s25 = smov 0   ;;  %s806_s26 = smov 0  }
   0x4 LB: > { %s590_s27 = sadd.s32 4294967295, %s756_s26   ;;  %s591_s28 = sadd.s32 4294967294, %s756_s26   ;;  %s756_s26 = sphi %s806_s26, %s19_s26   ;;  %s752_s25 = sphi %s804_s25, %s951_s25   ;;  %s748_s24 = sphi %s802_s24, %s950_s24   ;;  %s744_s23 = sphi %s800_s23, %s949_s23   ;;  %s740_s22 = sphi %s798_s22, %s948_s22   ;;  %s736_s21 = sphi %s796_s21, %s947_s21  }
   0x5   : > { %s38_s29 = sadd.s32 1, %s752_s25  ;;  %s187_s30 = sadd.s32 1, %s744_s23 }
   0x6   : > { %p40_p0 = scmp.ge.s32.totalorder %s38_s29, 2  ;;  %p197_p1 = scmp.ne.s32.totalorder %s744_s23, %s740_s22 }
   0x7   : > { %p198_p2 = scmp.eq.s32.totalorder %s590_s27, 1  ;;  %p203_p3 = scmp.ne.s32.totalorder %s740_s22, %s736_s21 }
   0x8   : > { %s953_s29 = smov (%p40_p0, %s38_s29), 0  ;;  %p204_p5 = scmp.eq.s32.totalorder %s591_s28, 1 }
   0x9   : > { %p836_p4 = por %p198_p2, %p197_p1  ;;  %s182_s8 = ssub.s32 %s752_s25, %s953_s29 }
   0xa   : > { %p594_p6 = scmp.ge.s32.totalorder %s756_s26, 1  ;;  %p185_p7 = scmp.eq.s32.totalorder %s182_s8, 0 }
   0xb   : > { %p843_p8 = por %p204_p5, %p203_p3  ;;  %p254_p9 = scmp.lt.s32.totalorder %s756_s26, 3 }
   0xc   : > { %s849_s10 = scalar_select %p185_p7, %s744_s23, %s187_s30  }
   0xd   : > { %p255_p10 = pnand %p594_p6, %p254_p9 }
   0xe   : > { %p293_p11 = scmp.lt.s32.totalorder (!%p255_p10), %s748_s24, 1  ;;  %s290_s11 = sand.u32 (!%p255_p10), 1, %s740_s22  }
   0xf   : > { %258 = sbr.rel (%p255_p10) target bundleno = 775 (0x307), region = 44  ;;  %s604_s13 = sshll.u32 (!%p255_p10), %s748_s24, 3 }
  0x10   : > { %s496_s16 = scalar_lea.hbm (!%p255_p10), %s944_s6, %s604_s13  ;;  %s698_s8 = scalar_lea.hbm (!%p255_p10), %s944_s6, 16 }
  0x11   : > { %s500_s19 = sshll.u32 (!%p255_p10), %s496_s16, 4  ;;  %s501_s19 = int_to_ptr.hbm [resolvable:$true] %s500_s19 }
  0x14   : > { %v354_v0 = vld [vmem:[%s940_s2 + $0x18] sm:$0xff]  ;;  %v353_v1 = vld [vmem:[%s940_s2 + $0x10] sm:$0xff]  ;;  %v352_v4 = vld [vmem:[%s940_s2 + $0x8] sm:$0xff]  ;;  %s294_s27 = scalar_select %p293_p11, %s748_s24, 1  ;;  %vm320_vm0 = vcmask 261120   ;;  %vm344_vm1 = vcmask 23552  }
  0x15   : > { %v315_v2 = vld [vmem:[%s942_s4 + $0x18] sm:$0xff]  ;;  %375 = vmatpush.msra.mxu1 %v354_v0  ;;  %v314_v3 = vld [vmem:[%s942_s4 + $0x10] sm:$0xff]  ;;  %v313_v5 = vld [vmem:[%s942_s4 + $0x8] sm:$0xff]  ;;  %vm346_vm2 = vcmask 7168   ;;  %v758_v19 = vmov -inf   ;;  %vm414_vm3 = vcmask 64512  }
  0x16   : > { %336 = vmatpush.msra.mxu0 %v315_v2  ;;  %v351_v6 = vld [vmem:[%s940_s2] sm:$0xff]  ;;  %s596_s12 = sshll.u32 %s294_s27, 3  ;;  %347 = vst.msk [vmem:[#allocation3] sm:$0xff] %vm346_vm2, %v758_v19  ;;  %v759_v22 = vmov 0   ;;  %v760_v23 = vmov 0.0   ;;  %s692_s27 = sshra.s32 %s501_s19, 4  ;;  %s693_s27 = int_to_ptr.hbm [resolvable:$true] %s692_s27 }
  0x17   : > { %376 = vmatpush.msra.mxu1 %v353_v1  ;;  %v312_v7 = vld [vmem:[%s942_s4] sm:$0xff]  ;;  %s306_s17 = scalar_lea.vmem %s939_s1, %s596_s12  ;;  %s299_s20 = scalar_lea.vmem %s938_s0, %s596_s12  ;;  %665 = vset.pattern.permute.xlu0 %v759_v22  ;;  %348 = vst.msk [vmem:[#allocation4] sm:$0xff] %vm346_vm2, %v760_v23 }
  0x18   : > { %337 = vmatpush.msra.mxu0 %v314_v3  ;;  %v350_v8 = vld [vmem:[%s306_s17] sm:$0xff]  ;;  %666 = vset.pattern.permute.xlu1 %v759_v22  ;;  %349 = vst.msk [vmem:[#allocation5] sm:$0xff] %vm320_vm0, %v760_v23  ;;  %s595_s12 = sshll.u32 %s290_s11, 3  ;;  %s694_s28 = scalar_lea.hbm %s693_s27, 8 }
  0x19   : > { %377 = vmatpush.msra.mxu1 %v352_v4  ;;  %v311_v9 = vld [vmem:[%s299_s20] sm:$0xff]  ;;  %463 = vmatpush.msra.mxu3 %v350_v8  ;;  %s292_s17 = scalar_lea.vmem [#allocation6], %s595_s12  ;;  %s485_s20 = scalar_lea.sflag [#allocation7], %s290_s11 }
  0x1a   : > { %338 = vmatpush.msra.mxu0 %v313_v5  ;;  %v668_v10 = vld [vmem:[%s941_s3] ss:$0 sm:$0xff]  ;;  %667 = vset.pattern.permute.xlu2 %v759_v22  ;;  %s498_s18 = sshll.u32 %s292_s17, 4  ;;  %p695_p12 = scmp.ne.s32.totalorder %s693_s27, %s694_s28  ;;  %s499_s18 = int_to_ptr.vmem [resolvable:$true] %s498_s18 }
  0x1b   : > { %378 = vmatpush.msra.mxu1 %v351_v6  ;;  %v669_v11 = vld [vmem:[%s943_s5] ss:$0 sm:$0xff]  ;;  %p699_p1 = scmp.lt.s32.totalorder %s693_s27, %s944_s6  ;;  %p700_p2 = scmp.lt.s32.totalorder %s698_s8, %s694_s28 }
  0x1c   : > { %339 = vmatpush.msra.mxu0 %v312_v7  ;;  %599 = vmatmul.msk.f32.vlgmr.msra.gmra.mxu1 %vm320_vm0, %v350_v8  ;;  %p696_p13 = pnand %p695_p12, %p836_p4 }
  0x1d   : > { %598 = vmatmul.msk.f32.vlgmr.msra.gmra.mxu0 %vm320_vm0, %v311_v9  ;;  %v413_v24 = vld [vmem:[#allocation3] sm:$0xff]  ;;  %p701_p3 = por %p700_p2, %p699_p1 }
  0x1e   : > { %v430_v35 = vld [vmem:[#allocation4] sm:$0xff]  ;;  %p697_p0 = pneg %p696_p13 }
  0x1f   : > { %v438_v41 = vld [vmem:[#allocation5] sm:$0xff] }
  0x20   : > { %p702_p5 = pnand %p701_p3, %p697_p0 }
  0x99   : > { %v380_v12 = vpop.f32.mrf.mxu1 }
  0x9a   : > { %v341_v13 = vpop.f32.mrf.mxu0  ;;  %v381_v14 = vadd.f32 %v668_v10, %v380_v12 }
  0x9b   : > { %v342_v15 = vadd.f32 %v669_v11, %v341_v13 }
  0x9c   : > { %670 = vtanh.f32 %v381_v14 }
  0x9d   : > { %345 = vst.msk [vmem:[#allocation2] sm:$0xff] %vm344_vm1, %v342_v15 }
  0xa2   : > { %v671_v16 = vpop.eup %670 }
  0xa3   : > { %v384_v17 = vmul.f32 0.57735026, %v671_v16 }
  0xa4   : > { %v385_v18 = vld [vmem:[#allocation2] sm:$0xff] }
  0xa5   : > { %600 = vmatpush.xpose.msk.msra.mxu2 %vm344_vm1, %v384_v17 }
  0xa8   : > { %601 = vmatmul.msk.f32.vlgmr.msra.gmra.mxu2 %vm344_vm1, %v385_v18 }
 0x12b   : > { %v410_v20 = vpop.f32.mrf.mxu2 }
 0x12c   : > { %v415_v21 = vsel %vm414_vm3, %v410_v20, -inf }
 0x12d   : > { %416 = vmax.xlane.f32.xlu0 %v415_v21 }
 0x1a0   : > { %v417_v25 = vpop.xlane.xlu0 %416 }
 0x1a1   : > { %v418_v26 = vmax.f32 %v413_v24, %v417_v25 }
 0x1a3   : > { %v419_v27 = vsub.f32 %v413_v24, %v418_v26  ;;  %470 = vst.msk [vmem:[#allocation3] sm:$0xff] %vm346_vm2, %v418_v26  ;;  %424 = vperm.xlu0 %665, %v418_v26  }
 0x1a5   : > { %v420_v33 = vmul.f32 1.442695, %v419_v27 }
 0x215   : > { %v425_v28 = vpop.permute.xlu0 %424 }
 0x216   : > { %v427_v29 = vsub.f32 %v410_v20, %v425_v28 }
 0x218   : > { %v428_v30 = vmul.f32 1.442695, %v427_v29 }
 0x21a   : > { %672 = vpow2.f32 %v428_v30 }
 0x21b   : > { %674 = vpow2.f32 %v420_v33 }
 0x220   : > { %v673_v31 = vpop.eup %672 }
 0x221   : > { %602 = vmatmul.msk.f32.vlgmr.msra.gmra.mxu3 %vm414_vm3, %v673_v31  ;;  %v432_v32 = vsel %vm414_vm3, %v673_v31, 0.0  ;;  %v675_v34 = vpop.eup %674 }
 0x222   : > { %433 = vadd.xlane.f32.xlu1 %v432_v32  ;;  %v431_v36 = vmul.f32 %v675_v34, %v430_v35 }
 0x23b   : > { %441 = vperm.xlu1 %666, %v675_v34  }
 0x295   : > { %v434_v37 = vpop.xlane.xlu1 %433 }
 0x296   : > { %v435_v38 = vadd.f32 %v434_v37, %v431_v36 }
 0x298   : > { %437 = vst.msk [vmem:[#allocation4] sm:$0xff] %vm346_vm2, %v435_v38 }
 0x29f   : > { %v475_v39 = vld [vmem:[#allocation4] sm:$0xff] }
 0x2a0   : > { %676 = vrcp.f32 %v475_v39 }
 0x2a4   : > { %v465_v44 = vpop.f32.mrf.mxu3 }
 0x2a6   : > { %v677_v40 = vpop.eup %676 }
 0x2a7   : > { %479 = vperm.xlu2 %667, %v677_v40  }
 0x2ad   : > { %v442_v42 = vpop.permute.xlu1 %441 }
 0x2ae   : > { %v444_v43 = vmul.f32 %v442_v42, %v438_v41 }
 0x2b0   : > { %v468_v45 = vadd.f32 %v465_v44, %v444_v43 }
 0x2b2   : > { %469 = vst.msk [vmem:[#allocation5] sm:$0xff] %vm320_vm0, %v468_v45 }
 0x2b9   : > { %v474_v46 = vld [vmem:[#allocation5] sm:$0xff] }
 0x301   : > { %v480_v47 = vpop.permute.xlu2 %479 }
 0x302   : > { %v482_v48 = vmul.f32 %v480_v47, %v474_v46 }
 0x304   : > { %483 = vst.msk [vmem:[%s292_s17] sm:$0xff] %vm320_vm0, %v482_v48 }
 0x305   : > { %705 = shalt.err (!%p702_p5)
}
 0x306   : > { %607 = dma.vmem_to_hbm [thread:$0]  (%p836_p4), %s499_s18, 128, %s501_s19, %s485_s20  }
 0x307 PF: > { %p613_p6 = scmp.ge.s32.totalorder %s756_s26, 2  ;;  %s512_s11 = sand.u32 1, %s736_s21  }
 0x308   : > { %s513_s14 = scalar_lea.sflag [#allocation7], %s512_s11 }
 0x309   : > { %p610_p7 = pnand %p613_p6, %p843_p8 }
 0x30b   : > { %p611_p9 = pneg %p610_p7 }
 0x30d   : > { %731 = dma.done.wait (%p611_p9), %s513_s14, 128  }
 0x30e   : > { %733 = vsyncadd (%p611_p9), %s513_s14, 4294967168  ;;  %s19_s26 = sadd.s32 1, %s756_s26   ;;  %s947_s21 = smov %s740_s22 }
 0x30f   : > { %p16_p10 = scmp.ge.s32.totalorder %s19_s26, 4   ;;  %s948_s22 = smov %s744_s23 }
 0x310   : > { %s949_s23 = smov %s849_s10  ;;  %s950_s24 = smov %s752_s25 }
 0x311   : > { %s951_s25 = smov %s953_s29  ;;  %18 = sbr.rel (!%p16_p10) target bundleno = 4 (0x4), region = 90 }
 0x316   :  { %519 = vsyncpa [#allocation7], 1 }
 0x317   :  { %521 = vsyncpa [#allocation7 + $0x1], 1 }

</bundles_post_ra>
